<compile_context>
chip_gen: v7x
topology: tpu7x:2x2x1
jax: 0.10.0
libtpu: 0.0.40
codegen_flags: <defaults>
</compile_context>

<pallas_src>
import jax
import jax.numpy as jnp
from jax.experimental import pallas as pl
from jax.experimental.pallas import tpu as pltpu


def _round_up(x, m):
    return ((x + m - 1) // m) * m


def _fclinear_kernel(x_ref, w_ref, b_ref, o_ref):
    # x_ref: (TR, F) VMEM tile of the folded input (F = P * D).
    # w_ref: (F, P)  VMEM resident block-diagonal weight.
    # b_ref: (1,)    SMEM scalar bias.
    # o_ref: (TR, P) VMEM output tile.
    x = x_ref[...].astype(jnp.float32)
    w = w_ref[...].astype(jnp.float32)
    acc = jnp.dot(x, w,
                  preferred_element_type=jnp.float32,
                  precision=jax.lax.Precision.HIGHEST)       # MXU, f32 accum
    o_ref[...] = (acc + b_ref[0]).astype(o_ref.dtype)


def _pick_fold(B, D):
    """Largest power-of-two P with P | B, P <= 128, P*D <= 4096 lanes and a
    block-diagonal weight of at most ~2 MiB."""
    p = 1
    while (p < 128
           and B % (2 * p) == 0
           and (2 * p) * D <= 4096
           and (2 * p) * (2 * p) * D * 4 <= (2 << 20)):
        p *= 2
    return p


def _pick_row_tile(R, row_bytes, resident_bytes):
    """Rows per grid step, sized by bytes of double-buffered working set."""
    budget = 24 * 1024 * 1024
    avail = max(budget - resident_bytes, 2 * 1024 * 1024)
    tr = max(8, (avail // (2 * row_bytes)) // 8 * 8)
    # Prefer >= ~4 grid steps (v7x megacore sharding across 2 TCs) as long as
    # each tile still carries >= ~1 MiB, so steps aren't overhead-dominated.
    min_tr = max(8, _round_up((1 << 20) // row_bytes, 8))
    quarter = _round_up(pl.cdiv(R, 4), 8)
    tr = min(tr, max(quarter, min_tr))
    if tr >= R:
        return R                       # single full-extent block
    if tr >= 128:
        tr = (tr // 128) * 128         # lane/sublane friendly row count
    return tr


def fclinear(x, weight, bias):
    """y = x @ weight.T + bias with weight: (1, D), bias: (1,). Returns (B, 1)."""
    B, D = x.shape
    x_itemsize = jnp.dtype(x.dtype).itemsize
    out_itemsize = x_itemsize

    # Fold P batch rows into the lane axis (free row-major reshape in HBM).
    P = _pick_fold(B, D)
    F = P * D
    R = B // P
    x_view = x.reshape(R, F)

    # Block-diagonal expansion of the (1, D) weight: wmat[p*D + d, p] = w[d].
    w_row = weight.reshape(D).astype(jnp.float32)
    wmat = (jnp.eye(P, dtype=jnp.float32)[:, None, :]
            * w_row[None, :, None]).reshape(F, P)
    b_sc = bias.reshape(1).astype(jnp.float32)               # (1,) -> SMEM

    # VMEM footprints (last dim lane-pads up to a multiple of 128).
    row_bytes = (_round_up(F, 128) * x_itemsize
                 + _round_up(P, 128) * out_itemsize)
    resident_bytes = 2 * F * _round_up(P, 128) * 4            # weight buffers
    TR = _pick_row_tile(R, row_bytes, resident_bytes)
    n_tiles = pl.cdiv(R, TR)

    y2d = pl.pallas_call(
        _fclinear_kernel,
        out_shape=jax.ShapeDtypeStruct((R, P), x.dtype),
        grid_spec=pltpu.PrefetchScalarGridSpec(
            num_scalar_prefetch=0,
            grid=(n_tiles,),
            in_specs=[
                pl.BlockSpec((TR, F), lambda i: (i, 0)),      # x streams
                pl.BlockSpec((F, P), lambda i: (0, 0)),       # weight resident
                pl.BlockSpec(memory_space=pltpu.MemorySpace.SMEM),  # bias
            ],
            out_specs=pl.BlockSpec((TR, P), lambda i: (i, 0)),
        ),
        compiler_params=pltpu.CompilerParams(
            dimension_semantics=("parallel",),   # v7x: shard tiles over 2 TCs
            vmem_limit_bytes=32 * 1024 * 1024,
        ),
        cost_estimate=pl.CostEstimate(
            flops=2 * B * D * P,
            transcendentals=0,
            bytes_accessed=B * D * x_itemsize + F * P * 4 + B * out_itemsize,
        ),
    )(x_view, wmat, b_sc)

    return y2d.reshape(B, 1)


if __name__ == "__main__":
    key = jax.random.PRNGKey(0)
    k_x, k_w, k_b = jax.random.split(key, 3)

    batch = 8
    input_size = 32   # inputSize of FClinear

    # Deterministic parameter init mirroring torch.nn.Linear default
    # (uniform in [-1/sqrt(fan_in), 1/sqrt(fan_in)]).
    bound = 1.0 / (input_size ** 0.5)
    weight = jax.random.uniform(k_w, (1, input_size), jnp.float32, -bound, bound)
    bias = jax.random.uniform(k_b, (1,), jnp.float32, -bound, bound)

    x = jax.random.normal(k_x, (batch, input_size), jnp.float32)

    y = fclinear(x, weight, bias)
    jax.block_until_ready(y)

    # Reference check (same math as torch nn.Linear), done as an exact-f32
    # elementwise multiply + reduce so the check is independent of matmul
    # precision modes.
    y_ref = (x.astype(jnp.float32) * weight).sum(axis=-1, keepdims=True) + bias
    assert y.shape == (batch, 1)
    assert jnp.allclose(y, y_ref, atol=2e-3, rtol=2e-3), (
        jnp.max(jnp.abs(y - y_ref)))

    print("KERNEL_OK")
</pallas_src>

<mosaic_0001>
module attributes {stable_mosaic.version = 11 : i64} {
  func.func @_fclinear_kernel(%arg0: i32, %arg1: memref<1x256xf32, #tpu.memory_space<vmem>>, %arg2: memref<256x8xf32, #tpu.memory_space<vmem>>, %arg3: memref<1xf32, #tpu.memory_space<smem>>, %arg4: memref<1x8xf32, #tpu.memory_space<vmem>>) attributes {dimension_semantics = [#tpu.dimension_semantics<parallel>], iteration_bounds = array<i64: 1>, scalar_prefetch = 0 : i64, scratch_operands = 0 : i64, tpu.core_type = #tpu.core_type<tc>, window_params = [{transform_indices = @transform_0, window_bounds = array<i64: 1, 256>}, {pipeline_mode = #tpu.pipeline_mode<synchronous>, transform_indices = @transform_1, window_bounds = array<i64: 256, 8>}, {transform_indices = @transform_2, window_bounds = array<i64: 1>}, {transform_indices = @transform_3, window_bounds = array<i64: 1, 8>}]} {
    %c0 = arith.constant 0 : index
    %c0_0 = arith.constant 0 : index
    %0 = vector.load %arg1[%c0, %c0_0] : memref<1x256xf32, #tpu.memory_space<vmem>>, vector<1x256xf32>
    %c0_1 = arith.constant 0 : index
    %c0_2 = arith.constant 0 : index
    %1 = vector.load %arg2[%c0_1, %c0_2] : memref<256x8xf32, #tpu.memory_space<vmem>>, vector<256x8xf32>
    %cst = arith.constant dense<0.000000e+00> : vector<1x8xf32>
    %2 = tpu.matmul %0, %1, %cst {dimension_numbers = #tpu.dot_dimension_numbers<[1], [0], [0], [1], [0, 0, 1, 1], [], []>, precision = #tpu.contract_precision<fp32>} : vector<1x256xf32>, vector<256x8xf32>, vector<1x8xf32> -> vector<1x8xf32>
    %c0_3 = arith.constant 0 : index
    %3 = memref.load %arg3[%c0_3] : memref<1xf32, #tpu.memory_space<smem>>
    %4 = vector.broadcast %3 : f32 to vector<1x8xf32>
    %5 = arith.addf %2, %4 : vector<1x8xf32>
    %c0_4 = arith.constant 0 : index
    %c0_5 = arith.constant 0 : index
    %6 = vector.load %arg4[%c0_4, %c0_5] : memref<1x8xf32, #tpu.memory_space<vmem>>, vector<1x8xf32>
    tpu.vector_store %arg4[%c0_4, %c0_5], %5 {strides = array<i32>} : memref<1x8xf32, #tpu.memory_space<vmem>>, vector<1x8xf32>,
    return
  }
  func.func @transform_0(%arg0: i32) -> (i32, i32) {
    %c0_i32 = arith.constant 0 : i32
    %c0_i32_0 = arith.constant 0 : i32
    return %arg0, %c0_i32 : i32, i32
  }
  func.func @transform_1(%arg0: i32) -> (i32, i32) {
    %c0_i32 = arith.constant 0 : i32
    %c0_i32_0 = arith.constant 0 : i32
    %c0_i32_1 = arith.constant 0 : i32
    return %c0_i32, %c0_i32_0 : i32, i32
  }
  func.func @transform_2(%arg0: i32) -> i32 {
    %c0_i32 = arith.constant 0 : i32
    %c0_i32_0 = arith.constant 0 : i32
    return %c0_i32 : i32
  }
  func.func @transform_3(%arg0: i32) -> (i32, i32) {
    %c0_i32 = arith.constant 0 : i32
    %c0_i32_0 = arith.constant 0 : i32
    return %arg0, %c0_i32 : i32, i32
  }
}

</mosaic_0001>

<bundles_post_ra>
// kernel: tpu_custom_call.1
= control target key start
LH: loop header
LB: loop body
LE: loop exit
PB: predicated region body
PF: predicated region fallthrough
CT: control target
= control target key end

     0   :  { %s1921_s0 = inlined_call_operand.vmem [shape: f32[1,256], index: 0, kind: input, shape index: {}]   ;;  %s1922_s1 = inlined_call_operand.vmem [shape: f32[256,8], index: 1, kind: input, shape index: {}]   ;;  %s1923_s2 = inlined_call_operand.<no memory space> [shape: f32[1], index: 2, kind: input, shape index: {}]   ;;  %s1924_s3 = inlined_call_operand.hbm [shape: f32[1,8], index: 3, kind: output, shape index: {}]  }
   0x1   :  { %v33_v0 = vld [vmem:[%s1922_s1 + $0x80] sm:$0xff]  ;;  %v34_v1 = vld [vmem:[%s1922_s1 + $0x88] sm:$0xff]  ;;  %v35_v7 = vld [vmem:[%s1922_s1 + $0x90] sm:$0xff] }
   0x2   :  { %v17_v2 = vld [vmem:[%s1922_s1] sm:$0xff]  ;;  %v111_v3 = vand.u32 4294901760, %v33_v0  ;;  %v114_v4 = vand.u32 4294901760, %v34_v1  ;;  %v18_v5 = vld [vmem:[%s1922_s1 + $0x8] sm:$0xff]  ;;  %v36_v8 = vld [vmem:[%s1922_s1 + $0x98] sm:$0xff]  ;;  %v117_v10 = vand.u32 4294901760, %v35_v7 }
   0x3   :  { %v63_v6 = vand.u32 4294901760, %v17_v2  ;;  %v66_v9 = vand.u32 4294901760, %v18_v5  ;;  %v120_v11 = vand.u32 4294901760, %v36_v8  ;;  %v19_v12 = vld [vmem:[%s1922_s1 + $0x10] sm:$0xff]  ;;  %v20_v13 = vld [vmem:[%s1922_s1 + $0x18] sm:$0xff]  ;;  %v37_v18 = vld [vmem:[%s1922_s1 + $0xa0] sm:$0xff] }
   0x4   :  { %v1412_v14 = vpack.c.bf16 %v114_v4, %v111_v3  ;;  %v69_v16 = vand.u32 4294901760, %v19_v12  ;;  %v72_v17 = vand.u32 4294901760, %v20_v13  ;;  %v38_v19 = vld [vmem:[%s1922_s1 + $0xa8] sm:$0xff]  ;;  %v21_v23 = vld [vmem:[%s1922_s1 + $0x20] sm:$0xff]  ;;  %v1435_v26 = vsub.f32 %v35_v7, %v117_v10  ;;  %v39_v38 = vld [vmem:[%s1922_s1 + $0xb0] sm:$0xff] }
   0x5   :  { %v1414_v15 = vsub.f32 %v17_v2, %v63_v6  ;;  %v1422_v20 = vpack.c.bf16 %v66_v9, %v63_v6  ;;  %v1424_v21 = vsub.f32 %v18_v5, %v66_v9  ;;  %v1426_v22 = vpack.c.bf16 %v120_v11, %v117_v10  ;;  %v22_v24 = vld [vmem:[%s1922_s1 + $0x28] sm:$0xff]  ;;  %v40_v43 = vld [vmem:[%s1922_s1 + $0xb8] sm:$0xff]  ;;  %v23_v56 = vld [vmem:[%s1922_s1 + $0x30] sm:$0xff] }
   0x6   :  { %1151 = vmatprep.subr.bf16.mxu0 %v1412_v14  ;;  %v1437_v27 = vsub.f32 %v36_v8, %v120_v11  ;;  %v1439_v28 = vpack.c.bf16 %v72_v17, %v69_v16  ;;  %v1441_v29 = vsub.f32 %v19_v12, %v69_v16  ;;  %v123_v30 = vand.u32 4294901760, %v37_v18  ;;  %v24_v57 = vld [vmem:[%s1922_s1 + $0x38] sm:$0xff] }
   0x7   :  { %1153 = vmatpush3.bf16.msra.mxu0 %v1422_v20  ;;  %v126_v31 = vand.u32 4294901760, %v38_v19  ;;  %v1444_v32 = vsub.f32 %v33_v0, %v111_v3  ;;  %v1446_v33 = vsub.f32 %v34_v1, %v114_v4  ;;  %v75_v34 = vand.u32 4294901760, %v21_v23 }
   0x8   :  { %1155 = vmatprep.subr.bf16.mxu0 %v1426_v22  ;;  %v78_v35 = vand.u32 4294901760, %v22_v24  ;;  %v1941_v36 = vand.u32 4294901760, %v1414_v15  ;;  %v1939_v37 = vand.u32 4294901760, %v1424_v21  ;;  %v1454_v39 = vsub.f32 %v20_v13, %v72_v17 }
   0x9   :  { %v1456_v40 = vpack.c.bf16 %v126_v31, %v123_v30  ;;  %v1458_v41 = vsub.f32 %v37_v18, %v123_v30  ;;  %v1944_v42 = vand.u32 4294901760, %v1444_v32  ;;  %v1464_v44 = vsub.f32 %v38_v19, %v126_v31 }
   0xa   :  { %v1942_v45 = vand.u32 4294901760, %v1446_v33  ;;  %v1467_v46 = vpack.c.bf16 %v78_v35, %v75_v34  ;;  %v1469_v47 = vsub.f32 %v21_v23, %v75_v34  ;;  %v178_v49 = vsub.f32 %v1414_v15, %v1941_v36 }
   0xb   :  { %1157 = vmatpush3.bf16.msra.mxu0 %v1439_v28  ;;  %v290_v48 = vsub.f32 %v1444_v32, %v1944_v42  ;;  %v185_v50 = vsub.f32 %v1424_v21, %v1939_v37  ;;  %v129_v51 = vand.u32 4294901760, %v39_v38  ;;  %v132_v53 = vand.u32 4294901760, %v40_v43 }
   0xc   :  { %1159 = vmatprep.subr.bf16.mxu0 %v1456_v40  ;;  %v297_v52 = vsub.f32 %v1446_v33, %v1942_v45  ;;  %v1938_v54 = vand.u32 4294901760, %v1435_v26  ;;  %v1937_v55 = vand.u32 4294901760, %v1437_v27  ;;  %v1493_v59 = vsub.f32 %v22_v24, %v78_v35 }
   0xd   :  { %v291_v58 = vand.u32 4294901760, %v290_v48  ;;  %v179_v60 = vand.u32 4294901760, %v178_v49  ;;  %v186_v61 = vand.u32 4294901760, %v185_v50 }
   0xe   :  { %9 = vsyncpa [#allocation4], 0  ;;  %v298_v62 = vand.u32 4294901760, %v297_v52  ;;  %v1495_v63 = vpack.c.bf16 %v132_v53, %v129_v51  ;;  %v1497_v0 = vsub.f32 %v39_v38, %v129_v51  ;;  %v304_v1 = vsub.f32 %v1435_v26, %v1938_v54  ;;  %v41_v6 = vld [vmem:[%s1922_s1 + $0xc0] sm:$0xff]  ;;  %v42_v7 = vld [vmem:[%s1922_s1 + $0xc8] sm:$0xff] }
   0xf   :  { %1161 = vmatpush3.bf16.msra.mxu0 %v1467_v46  ;;  %v1184_v2 = vpack.c.bf16 %v186_v61, %v179_v60  ;;  %v311_v3 = vsub.f32 %v1437_v27, %v1937_v55  ;;  %v81_v4 = vand.u32 4294901760, %v23_v56  ;;  %v84_v5 = vand.u32 4294901760, %v24_v57  ;;  %v25_v12 = vld [vmem:[%s1922_s1 + $0x40] sm:$0xff]  ;;  %v26_v31 = vld [vmem:[%s1922_s1 + $0x48] sm:$0xff]  ;;  %v44_v60 = vld [vmem:[%s1922_s1 + $0xd8] sm:$0xff] }
  0x10   :  { %v1182_v8 = vpack.c.bf16 %v298_v62, %v291_v58  ;;  %1163 = vmatprep.subr.bf16.mxu0 %v1495_v63  ;;  %v305_v9 = vand.u32 4294901760, %v304_v1  ;;  %v1934_v10 = vand.u32 4294901760, %v1441_v29  ;;  %v1932_v11 = vand.u32 4294901760, %v1454_v39 }
  0x11   :  { %v1518_v13 = vsub.f32 %v40_v43, %v132_v53  ;;  %v312_v16 = vand.u32 4294901760, %v311_v3  ;;  %v1520_v17 = vpack.c.bf16 %v84_v5, %v81_v4  ;;  %v1522_v18 = vsub.f32 %v23_v56, %v81_v4  ;;  %v27_v3 = vld [vmem:[%s1922_s1 + $0x50] sm:$0xff] }
  0x12   :  { %1183 = vmatprep.subr.bf16.mxu1 %v1182_v8  ;;  %v192_v19 = vsub.f32 %v1441_v29, %v1934_v10  ;;  %v199_v23 = vsub.f32 %v1454_v39, %v1932_v11  ;;  %v135_v24 = vand.u32 4294901760, %v41_v6  ;;  %v138_v30 = vand.u32 4294901760, %v42_v7 }
  0x13   :  { %1185 = vmatpush3.bf16.msra.mxu1 %v1184_v2  ;;  %v1186_v34 = vpack.c.bf16 %v312_v16, %v305_v9  ;;  %1165 = vmatpush3.bf16.msra.mxu0 %v1520_v17  ;;  %v1931_v35 = vand.u32 4294901760, %v1458_v41  ;;  %v1929_v38 = vand.u32 4294901760, %v1464_v44  ;;  %v87_v43 = vand.u32 4294901760, %v25_v12 }
  0x14   :  { %v1536_v48 = vsub.f32 %v24_v57, %v84_v5  ;;  %v193_v49 = vand.u32 4294901760, %v192_v19  ;;  %v200_v50 = vand.u32 4294901760, %v199_v23  ;;  %v1538_v51 = vpack.c.bf16 %v138_v30, %v135_v24  ;;  %v43_v57 = vld [vmem:[%s1922_s1 + $0xd0] sm:$0xff]  ;;  %v28_v23 = vld [vmem:[%s1922_s1 + $0x58] sm:$0xff] }
  0x15   :  { %1187 = vmatprep.subr.bf16.mxu1 %v1186_v34  ;;  %v1540_v52 = vsub.f32 %v41_v6, %v135_v24  ;;  %v318_v53 = vsub.f32 %v1458_v41, %v1931_v35  ;;  %v325_v56 = vsub.f32 %v1464_v44, %v1929_v38  ;;  %v90_v58 = vand.u32 4294901760, %v26_v31 }
  0x16   :  { %v1188_v61 = vpack.c.bf16 %v200_v50, %v193_v49  ;;  %1167 = vmatprep.subr.bf16.mxu0 %v1538_v51  ;;  %v1555_v62 = vsub.f32 %v42_v7, %v138_v30  ;;  %v1928_v1 = vand.u32 4294901760, %v1469_v47  ;;  %v1927_v2 = vand.u32 4294901760, %v1493_v59 }
  0x17   :  { %v319_v4 = vand.u32 4294901760, %v318_v53  ;;  %v326_v5 = vand.u32 4294901760, %v325_v56  ;;  %v1562_v6 = vpack.c.bf16 %v90_v58, %v87_v43  ;;  %v1564_v8 = vsub.f32 %v25_v12, %v87_v43 }
  0x18   :  { %1189 = vmatpush3.bf16.msra.mxu1 %v1188_v61  ;;  %v206_v7 = vsub.f32 %v1469_v47, %v1928_v1  ;;  %v213_v9 = vsub.f32 %v1493_v59, %v1927_v2  ;;  %v141_v16 = vand.u32 4294901760, %v43_v57  ;;  %v144_v19 = vand.u32 4294901760, %v44_v60 }
  0x19   :  { %v1190_v24 = vpack.c.bf16 %v326_v5, %v319_v4  ;;  %1169 = vmatpush3.bf16.msra.mxu0 %v1562_v6  ;;  %v1926_v12 = vand.u32 4294901760, %v1497_v0  ;;  %v1925_v30 = vand.u32 4294901760, %v1518_v13  ;;  %v93_v34 = vand.u32 4294901760, %v27_v3 }
  0x1a   :  { %v1578_v43 = vsub.f32 %v26_v31, %v90_v58  ;;  %v207_v49 = vand.u32 4294901760, %v206_v7  ;;  %v214_v50 = vand.u32 4294901760, %v213_v9  ;;  %v1580_v53 = vpack.c.bf16 %v144_v19, %v141_v16  ;;  %v45_v31 = vld [vmem:[%s1922_s1 + $0xe0] sm:$0xff]  ;;  %v46_v58 = vld [vmem:[%s1922_s1 + $0xe8] sm:$0xff] }
  0x1b   :  { %1191 = vmatprep.subr.bf16.mxu1 %v1190_v24  ;;  %v1582_v56 = vsub.f32 %v43_v57, %v141_v16  ;;  %v332_v61 = vsub.f32 %v1497_v0, %v1926_v12  ;;  %v339_v4 = vsub.f32 %v1518_v13, %v1925_v30  ;;  %v96_v5 = vand.u32 4294901760, %v28_v23  ;;  %v29_v24 = vld [vmem:[%s1922_s1 + $0x60] sm:$0xff] }
  0x1c   :  { %v1192_v7 = vpack.c.bf16 %v214_v50, %v207_v49  ;;  %1171 = vmatprep.subr.bf16.mxu0 %v1580_v53  ;;  %v1597_v57 = vsub.f32 %v44_v60, %v144_v19  ;;  %v1930_v9 = vand.u32 4294901760, %v1522_v18  ;;  %v1933_v16 = vand.u32 4294901760, %v1536_v48 }
  0x1d   :  { %v333_v30 = vand.u32 4294901760, %v332_v61  ;;  %v340_v12 = vand.u32 4294901760, %v339_v4  ;;  %v1604_v2 = vpack.c.bf16 %v96_v5, %v93_v34  ;;  %v1606_v1 = vsub.f32 %v27_v3, %v93_v34  ;;  %v30_v61 = vld [vmem:[%s1922_s1 + $0x68] sm:$0xff] }
  0x1e   :  { %1193 = vmatpush3.bf16.msra.mxu1 %v1192_v7  ;;  %v220_v60 = vsub.f32 %v1522_v18, %v1930_v9  ;;  %v227_v19 = vsub.f32 %v1536_v48, %v1933_v16  ;;  %v147_v49 = vand.u32 4294901760, %v45_v31  ;;  %v150_v50 = vand.u32 4294901760, %v46_v58 }
  0x1f   :  { %1969 = vst [vmem:[#allocation6_spill] sm:$0xff] %v1604_v2  ;;  %v1194_v4 = vpack.c.bf16 %v340_v12, %v333_v30  ;;  %1173 = vmatpush3.bf16.msra.mxu0 %v1604_v2  ;;  %v1936_v3 = vand.u32 4294901760, %v1540_v52  ;;  %v1935_v34 = vand.u32 4294901760, %v1555_v62  ;;  %v99_v7 = vand.u32 4294901760, %v29_v24 }
  0x20   :  { %v1620_v38 = vsub.f32 %v28_v23, %v96_v5  ;;  %v221_v9 = vand.u32 4294901760, %v220_v60  ;;  %v228_v35 = vand.u32 4294901760, %v227_v19  ;;  %v1622_v11 = vpack.c.bf16 %v150_v50, %v147_v49  ;;  %v47_v23 = vld [vmem:[%s1922_s1 + $0xf0] sm:$0xff]  ;;  %v48_v5 = vld [vmem:[%s1922_s1 + $0xf8] sm:$0xff] }
  0x21   :  { %1195 = vmatprep.subr.bf16.mxu1 %v1194_v4  ;;  %v1624_v16 = vsub.f32 %v45_v31, %v147_v49  ;;  %v346_v12 = vsub.f32 %v1540_v52, %v1936_v3  ;;  %v353_v30 = vsub.f32 %v1555_v62, %v1935_v34  ;;  %v102_v10 = vand.u32 4294901760, %v30_v61  ;;  %v31_v4 = vld [vmem:[%s1922_s1 + $0x70] sm:$0xff] }
  0x22   :  { %1970 = vst [vmem:[#allocation7_spill] sm:$0xff] %v1622_v11  ;;  %v1196_v60 = vpack.c.bf16 %v228_v35, %v221_v9  ;;  %1175 = vmatprep.subr.bf16.mxu0 %v1622_v11  ;;  %v1639_v31 = vsub.f32 %v46_v58, %v150_v50  ;;  %v1940_v19 = vand.u32 4294901760, %v1564_v8  ;;  %v1943_v49 = vand.u32 4294901760, %v1578_v43 }
  0x23   :  { %v347_v34 = vand.u32 4294901760, %v346_v12  ;;  %v354_v3 = vand.u32 4294901760, %v353_v30  ;;  %v1646_v55 = vpack.c.bf16 %v102_v10, %v99_v7  ;;  %v1648_v54 = vsub.f32 %v29_v24, %v99_v7  ;;  %v32_v12 = vld [vmem:[%s1922_s1 + $0x78] sm:$0xff] }
  0x24   :  { %1197 = vmatpush3.bf16.msra.mxu1 %v1196_v60  ;;  %v234_v35 = vsub.f32 %v1564_v8, %v1940_v19  ;;  %v241_v58 = vsub.f32 %v1578_v43, %v1943_v49  ;;  %v153_v9 = vand.u32 4294901760, %v47_v23  ;;  %v156_v50 = vand.u32 4294901760, %v48_v5 }
  0x25   :  { %1971 = vst [vmem:[#allocation8_spill] sm:$0xff] %v1646_v55  ;;  %v1198_v30 = vpack.c.bf16 %v354_v3, %v347_v34  ;;  %1177 = vmatpush3.bf16.msra.mxu0 %v1646_v55  ;;  %v1946_v24 = vand.u32 4294901760, %v1582_v56  ;;  %v1945_v7 = vand.u32 4294901760, %v1597_v57  ;;  %v105_v60 = vand.u32 4294901760, %v31_v4 }
  0x26   :  { %v1662_v37 = vsub.f32 %v30_v61, %v102_v10  ;;  %v235_v19 = vand.u32 4294901760, %v234_v35  ;;  %v242_v36 = vand.u32 4294901760, %v241_v58  ;;  %v1664_v45 = vpack.c.bf16 %v156_v50, %v153_v9 }
  0x27   :  { %1199 = vmatprep.subr.bf16.mxu1 %v1198_v30  ;;  %v1666_v49 = vsub.f32 %v47_v23, %v153_v9  ;;  %v360_v3 = vsub.f32 %v1582_v56, %v1946_v24  ;;  %v367_v34 = vsub.f32 %v1597_v57, %v1945_v7  ;;  %v108_v42 = vand.u32 4294901760, %v32_v12 }
  0x28   :  { %1972 = vst [vmem:[#allocation9_spill] sm:$0xff] %v1664_v45  ;;  %v1200_v25 = vpack.c.bf16 %v242_v36, %v235_v19  ;;  %1179 = vmatprep.subr.bf16.mxu0 %v1664_v45  ;;  %v1675_v10 = vsub.f32 %v48_v5, %v156_v50  ;;  %v1948_v61 = vand.u32 4294901760, %v1606_v1  ;;  %v1947_v35 = vand.u32 4294901760, %v1620_v38 }
  0x29   :  { %1973 = vst [vmem:[#allocation10_spill] sm:$0xff] %v1666_v49  ;;  %v361_v23 = vand.u32 4294901760, %v360_v3  ;;  %v368_v58 = vand.u32 4294901760, %v367_v34  ;;  %v1679_v9 = vpack.c.bf16 %v108_v42, %v105_v60  ;;  %v1681_v30 = vsub.f32 %v31_v4, %v105_v60  ;;  %v16_v4 = vld [vmem:[%s1921_s0] sm:$0x3] }
  0x2a   :  { %1974 = vst [vmem:[#allocation11_spill] sm:$0xff] %v1675_v10  ;;  %1201 = vmatpush3.bf16.msra.mxu1 %v1200_v25  ;;  %v248_v7 = vsub.f32 %v1606_v1, %v1948_v61  ;;  %v255_v36 = vsub.f32 %v1620_v38, %v1947_v35  ;;  %v1977_v5 = vlaneseq  ;;  %v1959_v50 = vand.u32 4294901760, %v1624_v16 }
  0x2b   :  { %1975 = vst [vmem:[#allocation12_spill] sm:$0xff] %v1679_v9  ;;  %1976 = vst [vmem:[#allocation13_spill] sm:$0xff] %v1681_v30  ;;  %v1202_v24 = vpack.c.bf16 %v368_v58, %v361_v23  ;;  %1181 = vmatpush3.bf16.msra.mxu0 %v1679_v9  ;;  %v1960_v25 = vand.u32 4294901760, %v1639_v31  ;;  %v1214_v60 = vpack.c.bf16 %v1446_v33, %v1444_v32  ;;  %v1961_v3 = vand.u32 4294901760, %v1648_v54 }
  0x2c   :  { %v53_v19 = vshrl.u32 %v1977_v5, 7  ;;  %v249_v34 = vand.u32 4294901760, %v248_v7  ;;  %v256_v35 = vand.u32 4294901760, %v255_v36  ;;  %v374_v23 = vsub.f32 %v1624_v16, %v1959_v50 }
  0x2d   :  { %1203 = vmatprep.subr.bf16.mxu1 %v1202_v24  ;;  %v381_v58 = vsub.f32 %v1639_v31, %v1960_v25  ;;  %1215 = vmatprep.subr.bf16.mxu0 %v1214_v60  ;;  %v262_v9 = vsub.f32 %v1648_v54, %v1961_v3  ;;  %v1962_v45 = vand.u32 4294901760, %v1662_v37  ;;  %v1709_v7 = vsub.f32 %v32_v12, %v108_v42 }
  0x2e   :  { %v54_v61 = vsub.s32 0, %v53_v19  ;;  %v58_v5 = vsub.s32 1, %v53_v19  ;;  %v1204_v36 = vpack.c.bf16 %v256_v35, %v249_v34  ;;  %v375_v55 = vand.u32 4294901760, %v374_v23 }
  0x2f   :  { %v382_v11 = vand.u32 4294901760, %v381_v58  ;;  %v263_v2 = vand.u32 4294901760, %v262_v9  ;;  %v269_v50 = vsub.f32 %v1662_v37, %v1962_v45  ;;  %v387_v3 = vand.u32 4294901760, %v1666_v49 }
  0x30   :  { %v55_v19 = vrot.slane %v16_v4, %v54_v61  ;;  %v59_v24 = vrot.slane %v16_v4, %v58_v5  ;;  %1205 = vmatpush3.bf16.msra.mxu1 %v1204_v36  ;;  %v394_v42 = vand.u32 4294901760, %v1675_v10  ;;  %v275_v61 = vand.u32 4294901760, %v1681_v30 }
  0x31   :  { %v1206_v12 = vpack.c.bf16 %v382_v11, %v375_v55  ;;  %v270_v35 = vand.u32 4294901760, %v269_v50  ;;  %v388_v34 = vsub.f32 %v1666_v49, %v387_v3  ;;  %v282_v55 = vand.u32 4294901760, %v1709_v7 }
  0x32   :  { %v1714_v60 = vand.u32 4294901760, %v59_v24  ;;  %v1716_v25 = vand.u32 4294901760, %v55_v19  ;;  %v395_v5 = vsub.f32 %v1675_v10, %v394_v42  ;;  %v276_v58 = vsub.f32 %v1681_v30, %v275_v61 }
  0x33   :  { %1207 = vmatprep.subr.bf16.mxu1 %v1206_v12  ;;  %v1208_v23 = vpack.c.bf16 %v270_v35, %v263_v2  ;;  %v389_v36 = vand.u32 4294901760, %v388_v34  ;;  %v283_v45 = vsub.f32 %v1709_v7, %v282_v55  ;;  %v1216_v10 = vpack.c.bf16 %v1424_v21, %v1414_v15 }
  0x34   :  { %1978 = vst [vmem:[#allocation14_spill] sm:$0xff] %v1714_v60  ;;  %v159_v4 = vsub.f32 %v59_v24, %v1714_v60  ;;  %v1723_v9 = vsub.f32 %v55_v19, %v1716_v25  ;;  %399 = vmatprep.mubr.f32.mxu1 %v1714_v60  ;;  %v396_v24 = vand.u32 4294901760, %v395_v5  ;;  %v277_v19 = vand.u32 4294901760, %v276_v58 }
  0x35   :  { %1209 = vmatpush3.bf16.msra.mxu1 %v1208_v23  ;;  %v284_v2 = vand.u32 4294901760, %v283_v45  ;;  %v1218_v34 = vpack.c.bf16 %v1437_v27, %v1435_v26  ;;  %v1220_v23 = vpack.c.bf16 %v1454_v39, %v1441_v29  ;;  %v1222_v58 = vpack.c.bf16 %v1464_v44, %v1458_v41 }
  0x36   :  { %v160_v11 = vand.u32 4294901760, %v159_v4  ;;  %v1968_v50 = vand.u32 4294901760, %v1723_v9  ;;  %v1210_v12 = vpack.c.bf16 %v396_v24, %v389_v36  ;;  %v1979_v36 = vand.u32 4294901760, %v1444_v32 }
  0x37   :  { %v1212_v5 = vpack.c.bf16 %v284_v2, %v277_v19  ;;  %v1980_v45 = vand.u32 4294901760, %v1446_v33  ;;  %v1982_v24 = vand.u32 4294901760, %v1424_v21  ;;  %v1983_v19 = vand.u32 4294901760, %v1435_v26 }
  0x38   :  { %v161_v49 = vsub.f32 %v159_v4, %v160_v11  ;;  %v167_v60 = vsub.f32 %v1723_v9, %v1968_v50  ;;  %1211 = vmatprep.subr.bf16.mxu1 %v1210_v12  ;;  %v1984_v2 = vand.u32 4294901760, %v1437_v27  ;;  %v1986_v32 = vand.u32 4294901760, %v1454_v39 }
  0x39   :  { %1213 = vmatpush3.bf16.msra.mxu1 %v1212_v5  ;;  %v1988_v21 = vand.u32 4294901760, %v1464_v44  ;;  %v1989_v26 = vand.u32 4294901760, %v1469_v47  ;;  %v1990_v27 = vand.u32 4294901760, %v1493_v59  ;;  %v1992_v39 = vand.u32 4294901760, %v1518_v13 }
  0x3a   :  { %v162_v35 = vand.u32 4294901760, %v161_v49  ;;  %v168_v30 = vand.u32 4294901760, %v167_v60  ;;  %v1278_v49 = vpack.c.bf16 %v1980_v45, %v1979_v36  ;;  %v1981_v60 = vand.u32 4294901760, %v1414_v15  ;;  %1247 = vmatprep.subr.bf16.mxu1 %v1412_v14 }
  0x3b   :  { %v1757_v50 = vpack.c.bf16 %v1984_v2, %v1983_v19  ;;  %v1987_v15 = vand.u32 4294901760, %v1458_v41  ;;  %v1775_v45 = vpack.c.bf16 %v1990_v27, %v1989_v26  ;;  %v1993_v41 = vand.u32 4294901760, %v1522_v18 }
  0x3c   :  { %163 = vmatprep.mubr.f32.mxu0 %v162_v35  ;;  %v1751_v12 = vpack.c.bf16 %v1982_v24, %v1981_v60  ;;  %v1985_v35 = vand.u32 4294901760, %v1441_v29  ;;  %v1991_v29 = vand.u32 4294901760, %v1497_v0  ;;  %v1994_v44 = vand.u32 4294901760, %v1536_v48  ;;  %401 = vmatmul.mubr.f32.vlgmr.msra.gmra.mrb[0].mxu1 %v1716_v25 }
  0x3d   :  { %169 = vmatmul.mubr.f32.vlgmr.msra.gmra.mrb[0].mxu0 %v168_v30  ;;  %v1769_v36 = vpack.c.bf16 %v1988_v21, %v1987_v15  ;;  %v1995_v60 = vand.u32 4294901760, %v1540_v52  ;;  %v1996_v24 = vand.u32 4294901760, %v1555_v62  ;;  %v1998_v2 = vand.u32 4294901760, %v1578_v43  ;;  %1249 = vmatpush3.bf16.msra.mxu1 %v1422_v20 }
  0x3e   :  { %v1763_v33 = vpack.c.bf16 %v1986_v32, %v1985_v35  ;;  %1217 = vmatpush3.bf16.msra.mxu0 %v1216_v10  ;;  %v1782_v30 = vpack.c.bf16 %v1992_v39, %v1991_v29  ;;  %v1788_v5 = vpack.c.bf16 %v1994_v44, %v1993_v41  ;;  %536 = vmatprep.mubr.f32.mxu0 %v159_v4  ;;  %v1997_v10 = vand.u32 4294901760, %v1564_v8 }
  0x3f   :  { %v1794_v19 = vpack.c.bf16 %v1996_v24, %v1995_v60  ;;  %1219 = vmatprep.subr.bf16.mxu0 %v1218_v34  ;;  %v1999_v32 = vand.u32 4294901760, %v1582_v56  ;;  %v2000_v15 = vand.u32 4294901760, %v1597_v57  ;;  %v2001_v26 = vand.u32 4294901760, %v1606_v1  ;;  %643 = vmatprep.mubr.f32.mxu1 %v160_v11 }
  0x40   :  { %v1800_v35 = vpack.c.bf16 %v1998_v2, %v1997_v10  ;;  %v2002_v27 = vand.u32 4294901760, %v1620_v38  ;;  %v2003_v4 = vand.u32 4294901760, %v1624_v16  ;;  %v2004_v34 = vand.u32 4294901760, %v1639_v31  ;;  %1251 = vmatprep.subr.bf16.mxu1 %v1426_v22 }
  0x41   :  { %v1806_v21 = vpack.c.bf16 %v2000_v15, %v1999_v32  ;;  %v2005_v41 = vand.u32 4294901760, %v1648_v54  ;;  %v2006_v44 = vand.u32 4294901760, %v1662_v37  ;;  %v1827_v24 = vpack.c.bf16 %v394_v42, %v387_v3  ;;  %1253 = vmatpush3.bf16.msra.mxu1 %v1439_v28 }
  0x42   :  { %v1812_v29 = vpack.c.bf16 %v2002_v27, %v2001_v26  ;;  %v1819_v39 = vpack.c.bf16 %v2004_v34, %v2003_v4  ;;  %v1829_v10 = vpack.c.bf16 %v282_v55, %v275_v61  ;;  %1221 = vmatpush3.bf16.msra.mxu0 %v1220_v23  ;;  %v1224_v2 = vpack.c.bf16 %v1493_v59, %v1469_v47 }
  0x43   :  { %v1825_v60 = vpack.c.bf16 %v2006_v44, %v2005_v41  ;;  %1223 = vmatprep.subr.bf16.mxu0 %v1222_v58  ;;  %v1226_v32 = vpack.c.bf16 %v1518_v13, %v1497_v0  ;;  %v1228_v3 = vpack.c.bf16 %v1536_v48, %v1522_v18  ;;  %1255 = vmatprep.subr.bf16.mxu1 %v1456_v40  ;;  %v2007_v48 = vld [vmem:[#allocation10_spill] sm:$0xff]  ;;  %vm924_vm0 = vcmask 57344  }
  0x44   :  { %v1230_v42 = vpack.c.bf16 %v1555_v62, %v1540_v52  ;;  %v1232_v47 = vpack.c.bf16 %v1578_v43, %v1564_v8  ;;  %v1234_v59 = vpack.c.bf16 %v1597_v57, %v1582_v56  ;;  %v1236_v0 = vpack.c.bf16 %v1620_v38, %v1606_v1  ;;  %v2008_v52 = vld [vmem:[#allocation11_spill] sm:$0xff]  ;;  %v2009_v8 = vld [vmem:[#allocation6_spill] sm:$0xff]  ;;  %v2010_v38 = vld [vmem:[#allocation13_spill] sm:$0xff] }
  0x45   :  { %1257 = vmatpush3.bf16.msra.mxu1 %v1467_v46  ;;  %v1238_v13 = vpack.c.bf16 %v1639_v31, %v1624_v16  ;;  %v1240_v18 = vpack.c.bf16 %v1662_v37, %v1648_v54  ;;  %v1242_v62 = vpack.c.bf16 %v2008_v52, %v2007_v48  ;;  %v1244_v1 = vpack.c.bf16 %v1709_v7, %v2010_v38  ;;  %v2011_v43 = vld [vmem:[#allocation7_spill] sm:$0xff]  ;;  %v2012_v56 = vld [vmem:[#allocation8_spill] sm:$0xff]  ;;  %v2013_v57 = vld [vmem:[#allocation9_spill] sm:$0xff] }
  0x46   :  { %1225 = vmatpush3.bf16.msra.mxu0 %v1224_v2  ;;  %1259 = vmatprep.subr.bf16.mxu1 %v1495_v63  ;;  %v2014_v37 = vld [vmem:[#allocation12_spill] sm:$0xff]  ;;  %v2015_v54 = vld [vmem:[#allocation14_spill] sm:$0xff]  ;;  %v2016_v16 = vand.u32 4294901760, %v1723_v9 }
  0x47   :  { %1227 = vmatprep.subr.bf16.mxu0 %v1226_v32 }
  0x49   :  { %1261 = vmatpush3.bf16.msra.mxu1 %v1520_v17 }
  0x4a   :  { %1229 = vmatpush3.bf16.msra.mxu0 %v1228_v3  ;;  %1263 = vmatprep.subr.bf16.mxu1 %v1538_v51 }
  0x4b   :  { %1231 = vmatprep.subr.bf16.mxu0 %v1230_v42 }
  0x4d   :  { %1265 = vmatpush3.bf16.msra.mxu1 %v1562_v6 }
  0x4e   :  { %1233 = vmatpush3.bf16.msra.mxu0 %v1232_v47  ;;  %1267 = vmatprep.subr.bf16.mxu1 %v1580_v53 }
  0x4f   :  { %1235 = vmatprep.subr.bf16.mxu0 %v1234_v59 }
  0x51   :  { %1269 = vmatpush3.bf16.msra.mxu1 %v2009_v8 }
  0x52   :  { %1237 = vmatpush3.bf16.msra.mxu0 %v1236_v0  ;;  %1271 = vmatprep.subr.bf16.mxu1 %v2011_v43 }
  0x53   :  { %1239 = vmatprep.subr.bf16.mxu0 %v1238_v13 }
  0x55   :  { %1273 = vmatpush3.bf16.msra.mxu1 %v2012_v56 }
  0x56   :  { %1241 = vmatpush3.bf16.msra.mxu0 %v1240_v18  ;;  %1275 = vmatprep.subr.bf16.mxu1 %v2013_v57 }
  0x57   :  { %1243 = vmatprep.subr.bf16.mxu0 %v1242_v62 }
  0x59   :  { %1277 = vmatpush3.bf16.msra.mxu1 %v2014_v37 }
  0x5a   :  { %1245 = vmatpush3.bf16.msra.mxu0 %v1244_v1  ;;  %1311 = vmatprep.subr.bf16.mxu1 %v1412_v14 }
  0x5b   :  { %1279 = vmatprep.subr.bf16.mxu0 %v1278_v49 }
  0x5c   :  { %647 = vmatmul.mubr.f32.vlgmr.msra.gmra.mrb[2].mxu1 %v2016_v16 }
  0x5d   :  { %539 = vmatmul.mubr.f32.vlgmr.msra.gmra.mrb[2].mxu0 %v1723_v9  ;;  %1313 = vmatpush3.bf16.msra.mxu1 %v1422_v20  ;;  %v50_v20 = vstv %s1923_s2  ;;  %s1367_s2 = smov [#allocation3]  }
  0x5e   :  { %1281 = vmatpush3.bf16.msra.mxu0 %v1751_v12  ;;  %813 = vmatprep.mubr.f32.mxu0 %v2015_v54  ;;  %s932_s24 = sshll.u32 %s1367_s2, 4  ;;  %s933_s24 = int_to_ptr.vmem [resolvable:$true] %s932_s24 }
  0x5f   :  { %1283 = vmatprep.subr.bf16.mxu0 %v1757_v50  ;;  %917 = vmatprep.mubr.f32.mxu1 %v2015_v54  ;;  %s1343_s25 = scalar_lea.vmem %s933_s24, 16  ;;  %s1347_s26 = scalar_lea.vmem %s933_s24, 32 }
  0x60   :  { %1315 = vmatprep.subr.bf16.mxu1 %v1426_v22  ;;  %p1344_p0 = scmp.ne.s32.totalorder %s933_s24, %s1343_s25  ;;  %p1348_p1 = scmp.lt.s32.totalorder %s933_s24, %s933_s24 }
  0x61   :  { %1317 = vmatpush3.bf16.msra.mxu1 %v1439_v28  ;;  %p1349_p2 = scmp.lt.s32.totalorder %s1347_s26, %s1343_s25 }
  0x62   :  { %1285 = vmatpush3.bf16.msra.mxu0 %v1763_v33  ;;  %1319 = vmatprep.subr.bf16.mxu1 %v1456_v40 }
  0x63   :  { %1287 = vmatprep.subr.bf16.mxu0 %v1769_v36  ;;  %p1350_p3 = por %p1349_p2, %p1348_p1 }
  0x65   :  { %1321 = vmatpush3.bf16.msra.mxu1 %v1467_v46  ;;  %p1351_p4 = pnand %p1350_p3, %p1344_p0 }
  0x66   :  { %1289 = vmatpush3.bf16.msra.mxu0 %v1775_v45  ;;  %1323 = vmatprep.subr.bf16.mxu1 %v1495_v63 }
  0x67   :  { %1291 = vmatprep.subr.bf16.mxu0 %v1782_v30 }
  0x69   :  { %1325 = vmatpush3.bf16.msra.mxu1 %v1520_v17 }
  0x6a   :  { %1293 = vmatpush3.bf16.msra.mxu0 %v1788_v5  ;;  %1327 = vmatprep.subr.bf16.mxu1 %v1538_v51 }
  0x6b   :  { %1295 = vmatprep.subr.bf16.mxu0 %v1794_v19 }
  0x6d   :  { %1329 = vmatpush3.bf16.msra.mxu1 %v1562_v6 }
  0x6e   :  { %1297 = vmatpush3.bf16.msra.mxu0 %v1800_v35  ;;  %1331 = vmatprep.subr.bf16.mxu1 %v1580_v53 }
  0x6f   :  { %1299 = vmatprep.subr.bf16.mxu0 %v1806_v21 }
  0x71   :  { %1333 = vmatpush3.bf16.msra.mxu1 %v2009_v8 }
  0x72   :  { %1301 = vmatpush3.bf16.msra.mxu0 %v1812_v29  ;;  %1335 = vmatprep.subr.bf16.mxu1 %v2011_v43 }
  0x73   :  { %1303 = vmatprep.subr.bf16.mxu0 %v1819_v39 }
  0x75   :  { %1337 = vmatpush3.bf16.msra.mxu1 %v2012_v56 }
  0x76   :  { %1305 = vmatpush3.bf16.msra.mxu0 %v1825_v60  ;;  %1339 = vmatprep.subr.bf16.mxu1 %v2013_v57 }
  0x77   :  { %1307 = vmatprep.subr.bf16.mxu0 %v1827_v24 }
  0x79   :  { %1341 = vmatpush3.bf16.msra.mxu1 %v2014_v37 }
  0x7a   :  { %1309 = vmatpush3.bf16.msra.mxu0 %v1829_v10 }
  0x7c   :  { %919 = vmatmul.mubr.f32.vlgmr.msra.gmra.mrb[4].mxu1 %v1716_v25 }
  0x7d   :  { %815 = vmatmul.mubr.f32.vlgmr.msra.gmra.mrb[4].mxu0 %v1716_v25 }
 0x10f   :  { %v1007_v40 = vpop.f32.mrb[0].mxu1 }
 0x110   :  { %v972_v14 = vpop.f32.mrb[0].mxu0  ;;  %v1008_v63 = vpop.f32.mrb[1].mxu1 }
 0x111   :  { %v973_v22 = vpop.f32.mrb[1].mxu0  ;;  %v1009_v17 = vadd.f32 %v1008_v63, %v1007_v40 }
 0x112   :  { %v974_v28 = vadd.f32 %v973_v22, %v972_v14 }
 0x114   :  { %v171_v46 = vadd.f32 %v974_v28, %v50_v20 }
 0x116   :  { %v403_v51 = vadd.f32 %v1009_v17, %v171_v46 }
 0x12f   :  { %v1077_v7 = vpop.f32.mrb[2].mxu1 }
 0x130   :  { %v1042_v6 = vpop.f32.mrb[2].mxu0  ;;  %v1078_v9 = vpop.f32.mrb[3].mxu1 }
 0x131   :  { %v1043_v53 = vpop.f32.mrb[3].mxu0  ;;  %v1079_v55 = vadd.f32 %v1078_v9, %v1077_v7 }
 0x132   :  { %v1044_v31 = vadd.f32 %v1043_v53, %v1042_v6 }
 0x134   :  { %v541_v61 = vadd.f32 %v1044_v31, %v403_v51 }
 0x136   :  { %v649_v25 = vadd.f32 %v1079_v55, %v541_v61 }
 0x14f   :  { %v1147_v58 = vpop.f32.mrb[4].mxu1 }
 0x150   :  { %v1112_v11 = vpop.f32.mrb[4].mxu0  ;;  %v1148_v12 = vpop.f32.mrb[5].mxu1 }
 0x151   :  { %v1113_v50 = vpop.f32.mrb[5].mxu0  ;;  %v1149_v33 = vadd.f32 %v1148_v12, %v1147_v58 }
 0x152   :  { %v1114_v23 = vadd.f32 %v1113_v50, %v1112_v11 }
 0x154   :  { %v817_v49 = vadd.f32 %v1114_v23, %v649_v25 }
 0x156   :  { %v921_v36 = vadd.f32 %v1149_v33, %v817_v49 }
 0x158   :  { %925 = vst.msk [vmem:[#allocation3] sm:$0x1] %vm924_vm0, %v921_v36 }
 0x159   :  { %1354 = shalt.err (!%p1351_p4)
}
 0x15a   :  { %s1355_s29 = scalar_lea.hbm %s1924_s3, 16 }
 0x15b   :  { %p1356_p5 = scmp.ne.s32.totalorder %s1924_s3, %s1355_s29  ;;  %p1359_p6 = scmp.lt.u32.totalorder %s1355_s29, %s1924_s3 }
 0x15d   :  { %p1361_p7 = pnand %p1359_p6, %p1356_p5 }
 0x15f   :  { %1364 = shalt.err (!%p1361_p7)
}
 0x160   :  { %935 = dma.vmem_to_hbm [thread:$0]  %s933_s24, 16, %s1924_s3, [#allocation4]  }
 0x161   :  { %1365 = dma.done.wait [#allocation4], 16  }
 0x162   :  { %1366 = vsyncadd [#allocation4], 4294967280 }
 0x163   :  { %939 = vsyncpa [#allocation4], 1 }

</bundles_post_ra>
